<compile_context>
chip_gen: v5e
topology: v5e:2x2
jax: 0.10.0
libtpu: 0.0.40
codegen_flags: <defaults>
</compile_context>

<pallas_src>
import jax
import jax.numpy as jnp
from jax.experimental import pallas as pl
from jax.experimental.pallas import tpu as pltpu


def _round_up(x: int, m: int) -> int:
    return ((x + m - 1) // m) * m


def _cdiv(a: int, b: int) -> int:
    return -(-a // b)


def _vmem_budget_bytes() -> int:
    """~80% of this generation's VMEM (v5e/v6e: ~102 MiB, v7x: ~51 MiB)."""
    try:
        cap = int(pltpu.get_tpu_info().vmem_capacity_bytes)
    except Exception:
        cap = 64 << 20  # conservative default (v7x per-TC VMEM)
    return int(cap * 0.8)


# ---------------------------------------------------------------------------
# Kernel
# ---------------------------------------------------------------------------
def _kan_kernel(x_ref, w_ref, b_ref, o_ref):
    """Fused matmul + bias + (identity, square) activations + weighted sum.

    x_ref: (TB, N_in)     batch tile, original input dtype (cast on VPU below)
    w_ref: (2, N_in, TN)  weight tile; plane 0 = identity cols (w0 folded in),
                          plane 1 = square cols (sqrt(w1) folded in)
    b_ref: (2, 1, TN)     bias tile (same folding / layout), f32
    o_ref: (TB, TN)       output tile (lane-dense, 128-aligned columns)
    """
    # In-kernel cast: free under the MXU, avoids a wrapper-side HBM pass over x.
    x = x_ref[...].astype(w_ref.dtype)
    y0 = jnp.dot(x, w_ref[0], preferred_element_type=jnp.float32) + b_ref[0]
    y1 = jnp.dot(x, w_ref[1], preferred_element_type=jnp.float32) + b_ref[1]
    o_ref[...] = (y0 + y1 * y1).astype(o_ref.dtype)


# ---------------------------------------------------------------------------
# One-time parameter preparation (hoisted out of the forward hot path)
# ---------------------------------------------------------------------------
def prepare_dense_kan_params(w_lin, b_lin, w_reg, *, n_output, num_act=3,
                             lane_pad=128, param_dtype=jnp.bfloat16):
    """Fold + repack the torch parameters for the fused kernel.

    w_lin: (N_output*num_act, N_input)  torch Linear.weight
    b_lin: (N_output*num_act,)          torch Linear.bias
    w_reg: (N_output, 1, num_act)       torch grouped-Conv1d weight

    Returns (w_packed, b_packed, n_out_padded):
      w_packed: (2, N_input, n_out_padded) in `param_dtype`
                plane 0: identity-activation columns (w0 folded in)
                plane 1: square-activation columns (sqrt(w1) folded in)
      b_packed: (2, 1, n_out_padded) float32 (same folding / layout)
    """
    n_in = w_lin.shape[1]

    # |w| + per-channel normalization of the regression (grouped conv) weight.
    w_abs = jnp.abs(w_reg[:, 0, :])                       # (N_out, num_act)
    sum_w = jnp.sum(w_abs, axis=1, keepdims=True)
    sum_w = jnp.where(sum_w > 0, sum_w, jnp.ones_like(sum_w))
    w_norm = w_abs / sum_w                                # (N_out, num_act)
    w0 = w_norm[:, 0]                                     # identity weight >= 0
    s1 = jnp.sqrt(w_norm[:, 1])                           # sqrt(square weight) >= 0
    # (activation k=2 is x*0 -> contributes nothing; dropped entirely.)

    w3 = w_lin.reshape(n_output, num_act, n_in)           # rows are o*num_act + k
    b3 = b_lin.reshape(n_output, num_act)
    w_id = (w3[:, 0, :] * w0[:, None]).T                  # (N_in, N_out)
    w_sq = (w3[:, 1, :] * s1[:, None]).T                  # (N_in, N_out)
    b_id = b3[:, 0] * w0
    b_sq = b3[:, 1] * s1

    n_out_p = _round_up(n_output, lane_pad)               # lane-dense output width
    pad = n_out_p - n_output
    if pad:
        w_id = jnp.pad(w_id, ((0, 0), (0, pad)))
        w_sq = jnp.pad(w_sq, ((0, 0), (0, pad)))
        b_id = jnp.pad(b_id, (0, pad))
        b_sq = jnp.pad(b_sq, (0, pad))

    # TODO(synk): optional K padding to 256 (v6e/v7x MXU width) and an fp8
    # weight path with per-channel scales folded into w0/sqrt(w1) for v7x.
    w_packed = jnp.stack([w_id, w_sq], axis=0).astype(param_dtype)
    b_packed = jnp.stack([b_id, b_sq], axis=0)[:, None, :].astype(jnp.float32)
    return w_packed, b_packed, n_out_p


# ---------------------------------------------------------------------------
# Forward
# ---------------------------------------------------------------------------
def dense_kan_forward(x, w_packed, b_packed, *, n_output, tb=256,
                      out_dtype=jnp.float32):
    """Run the DenseKanLayer forward pass with the fused Pallas kernel.

    x:        (B, N_input) — any batch size (ragged last tile, no padding copy).
    w_packed/b_packed: output of prepare_dense_kan_params (reusable per call).
    out_dtype: set jnp.bfloat16 if the consumer accepts it (halves writeback).
    """
    B, n_in = x.shape
    assert w_packed.shape[0] == 2 and w_packed.shape[1] == n_in
    n_out_p = w_packed.shape[2]

    row_align = 8 if jnp.dtype(out_dtype).itemsize >= 4 else 16
    tb = max(row_align, min(_round_up(tb, row_align), _round_up(B, row_align)))

    budget = _vmem_budget_bytes()
    x_bpe = jnp.dtype(x.dtype).itemsize
    w_bpe = jnp.dtype(w_packed.dtype).itemsize
    o_bpe = jnp.dtype(out_dtype).itemsize

    def footprint(tbi, tni):
        return (2 * tbi * n_in * x_bpe            # double-buffered x tile
                + 2 * 2 * n_in * tni * w_bpe      # double-buffered weight tile
                + 2 * 2 * tni * 4                 # double-buffered bias tile
                + 2 * tbi * tni * o_bpe           # double-buffered output tile
                + 3 * tbi * tni * 4)              # f32 intermediates y0/y1/sum

    # Shrink the N_out tile, then the batch tile, until the step fits in VMEM.
    tn = n_out_p
    while tn > 128 and footprint(tb, tn) > budget:
        tn = max(128, _round_up(tn // 2, 128))
    while tb > row_align and footprint(tb, tn) > budget:
        tb = max(row_align, _round_up(tb // 2, row_align))
    # TODO(synk): if footprint(tb, tn) still exceeds the budget (enormous
    # N_input), add a K grid axis marked "arbitrary" with a VMEM f32 accumulator.

    grid_b = _cdiv(B, tb)
    grid_n = _cdiv(n_out_p, tn)

    # v7x has 2 TensorCores: guarantee >= 2 "parallel" grid steps when possible.
    if grid_b * grid_n == 1:
        if n_out_p >= 256:
            tn = _round_up(_cdiv(n_out_p, 2), 128)
            grid_n = _cdiv(n_out_p, tn)
        elif tb >= 2 * row_align:
            tb = _round_up(_cdiv(tb, 2), row_align)
            grid_b = _cdiv(B, tb)

    grid_spec = pltpu.PrefetchScalarGridSpec(
        num_scalar_prefetch=0,
        grid=(grid_b, grid_n),
        in_specs=[
            pl.BlockSpec((tb, n_in), lambda i, j: (i, 0)),
            pl.BlockSpec((2, n_in, tn), lambda i, j: (0, 0, j)),
            pl.BlockSpec((2, 1, tn), lambda i, j: (0, 0, j)),
        ],
        out_specs=pl.BlockSpec((tb, tn), lambda i, j: (i, j)),
    )

    out = pl.pallas_call(
        _kan_kernel,
        out_shape=jax.ShapeDtypeStruct((B, n_out_p), out_dtype),
        grid_spec=grid_spec,
        compiler_params=pltpu.CompilerParams(
            dimension_semantics=("parallel", "parallel"),
            vmem_limit_bytes=int(budget)),
    )(x, w_packed, b_packed)

    return out[:, :n_output]


# ---------------------------------------------------------------------------
# Pure-JAX reference (mirrors the PyTorch forward exactly)
# ---------------------------------------------------------------------------
def dense_kan_reference(x, w_lin, b_lin, w_reg, *, n_output, num_act=3):
    y = x @ w_lin.T + b_lin                                        # (B, 3*N_out)
    y = y.reshape(-1, n_output, num_act)
    activated = jnp.stack(
        [y[:, :, 0], jnp.square(y[:, :, 1]), y[:, :, 2] * 0.0], axis=2)
    w_abs = jnp.abs(w_reg[:, 0, :])
    sum_w = jnp.sum(w_abs, axis=1, keepdims=True)
    sum_w = jnp.where(sum_w > 0, sum_w, jnp.ones_like(sum_w))
    w_norm = w_abs / sum_w                                         # (N_out, num_act)
    return jnp.sum(activated * w_norm[None, :, :], axis=2)         # (B, N_out)


if __name__ == "__main__":
    B, N_INPUT, N_OUTPUT, NUM_ACT = 16, 32, 16, 3

    key = jax.random.PRNGKey(0)
    kx, kw, kb, kr = jax.random.split(key, 4)

    x = jax.random.normal(kx, (B, N_INPUT), dtype=jnp.float32)
    # torch.nn.Linear(N_input, N_output*num_act): weight (out, in), bias (out,)
    w_lin = jax.random.normal(kw, (N_OUTPUT * NUM_ACT, N_INPUT),
                              dtype=jnp.float32) * 0.1
    b_lin = jax.random.normal(kb, (N_OUTPUT * NUM_ACT,), dtype=jnp.float32) * 0.1
    # torch.nn.Conv1d(N_output, N_output, kernel_size=num_act, groups=N_output):
    # weight (N_output, 1, num_act)
    w_reg = jax.random.normal(kr, (N_OUTPUT, 1, NUM_ACT), dtype=jnp.float32)

    ref = dense_kan_reference(x, w_lin, b_lin, w_reg,
                              n_output=N_OUTPUT, num_act=NUM_ACT)

    # Exact-math check: f32 params, tight tolerance.
    w_f32, b_f32, _ = prepare_dense_kan_params(
        w_lin, b_lin, w_reg, n_output=N_OUTPUT, num_act=NUM_ACT,
        param_dtype=jnp.float32)
    out_f32 = jax.block_until_ready(
        dense_kan_forward(x, w_f32, b_f32, n_output=N_OUTPUT))
    assert out_f32.shape == (B, N_OUTPUT)
    assert jnp.allclose(out_f32, ref, atol=1e-5, rtol=1e-5), "f32 mismatch"

    # Default fast path: bf16 params (f32 MXU accumulation + f32 epilogue).
    # The squared branch doubles the relative quantization error of the folded
    # sqrt(w1), so the tolerance is looser — this is quantization, not a bug.
    w_bf16, b_pk, _ = prepare_dense_kan_params(
        w_lin, b_lin, w_reg, n_output=N_OUTPUT, num_act=NUM_ACT)
    out_bf16 = jax.block_until_ready(
        dense_kan_forward(x, w_bf16, b_pk, n_output=N_OUTPUT))
    assert out_bf16.shape == (B, N_OUTPUT)
    assert jnp.allclose(out_bf16, ref, atol=7e-2, rtol=7e-2), "bf16 mismatch"

    print("KERNEL_OK")
</pallas_src>

<mosaic_0001>
module attributes {stable_mosaic.version = 11 : i64} {
  func.func @_kan_kernel(%arg0: i32, %arg1: i32, %arg2: memref<8x32xf32, #tpu.memory_space<vmem>>, %arg3: memref<2x32x128xf32, #tpu.memory_space<vmem>>, %arg4: memref<2x1x128xf32, #tpu.memory_space<vmem>>, %arg5: memref<8x128xf32, #tpu.memory_space<vmem>>) attributes {dimension_semantics = [#tpu.dimension_semantics<parallel>, #tpu.dimension_semantics<parallel>], iteration_bounds = array<i64: 2, 1>, scalar_prefetch = 0 : i64, scratch_operands = 0 : i64, tpu.core_type = #tpu.core_type<tc>, window_params = [{transform_indices = @transform_0, window_bounds = array<i64: 8, 32>}, {transform_indices = @transform_1, window_bounds = array<i64: 2, 32, 128>}, {transform_indices = @transform_2, window_bounds = array<i64: 2, 1, 128>}, {transform_indices = @transform_3, window_bounds = array<i64: 8, 128>}]} {
    %c0 = arith.constant 0 : index
    %c0_0 = arith.constant 0 : index
    %0 = vector.load %arg2[%c0, %c0_0] : memref<8x32xf32, #tpu.memory_space<vmem>>, vector<8x32xf32>
    %c0_1 = arith.constant 0 : index
    %c0_2 = arith.constant 0 : index
    %c0_3 = arith.constant 0 : index
    %1 = vector.load %arg3[%c0_1, %c0_2, %c0_3] : memref<2x32x128xf32, #tpu.memory_space<vmem>>, vector<1x32x128xf32>
    %2 = vector.shape_cast %1 : vector<1x32x128xf32> to vector<32x128xf32>
    %cst = arith.constant dense<0.000000e+00> : vector<8x128xf32>
    %3 = tpu.matmul %0, %2, %cst {dimension_numbers = #tpu.dot_dimension_numbers<[1], [0], [0], [1], [0, 0, 1, 1], [], []>} : vector<8x32xf32>, vector<32x128xf32>, vector<8x128xf32> -> vector<8x128xf32>
    %c0_4 = arith.constant 0 : index
    %c0_5 = arith.constant 0 : index
    %c0_6 = arith.constant 0 : index
    %4 = vector.load %arg4[%c0_4, %c0_5, %c0_6] : memref<2x1x128xf32, #tpu.memory_space<vmem>>, vector<1x1x128xf32>
    %5 = vector.shape_cast %4 : vector<1x1x128xf32> to vector<1x128xf32>
    %6 = vector.broadcast %5 : vector<1x128xf32> to vector<8x128xf32>
    %7 = arith.addf %3, %6 : vector<8x128xf32>
    %c1 = arith.constant 1 : index
    %c0_7 = arith.constant 0 : index
    %c0_8 = arith.constant 0 : index
    %8 = vector.load %arg3[%c1, %c0_7, %c0_8] : memref<2x32x128xf32, #tpu.memory_space<vmem>>, vector<1x32x128xf32>
    %9 = vector.shape_cast %8 : vector<1x32x128xf32> to vector<32x128xf32>
    %cst_9 = arith.constant dense<0.000000e+00> : vector<8x128xf32>
    %10 = tpu.matmul %0, %9, %cst_9 {dimension_numbers = #tpu.dot_dimension_numbers<[1], [0], [0], [1], [0, 0, 1, 1], [], []>} : vector<8x32xf32>, vector<32x128xf32>, vector<8x128xf32> -> vector<8x128xf32>
    %c1_10 = arith.constant 1 : index
    %c0_11 = arith.constant 0 : index
    %c0_12 = arith.constant 0 : index
    %11 = vector.load %arg4[%c1_10, %c0_11, %c0_12] : memref<2x1x128xf32, #tpu.memory_space<vmem>>, vector<1x1x128xf32>
    %12 = vector.shape_cast %11 : vector<1x1x128xf32> to vector<1x128xf32>
    %13 = vector.broadcast %12 : vector<1x128xf32> to vector<8x128xf32>
    %14 = arith.addf %10, %13 : vector<8x128xf32>
    %15 = arith.mulf %14, %14 : vector<8x128xf32>
    %16 = arith.addf %7, %15 : vector<8x128xf32>
    %c0_13 = arith.constant 0 : index
    %c0_14 = arith.constant 0 : index
    %17 = vector.load %arg5[%c0_13, %c0_14] : memref<8x128xf32, #tpu.memory_space<vmem>>, vector<8x128xf32>
    tpu.vector_store %arg5[%c0_13, %c0_14], %16 {strides = array<i32>} : memref<8x128xf32, #tpu.memory_space<vmem>>, vector<8x128xf32>,
    return
  }
  func.func @transform_0(%arg0: i32, %arg1: i32) -> (i32, i32) {
    %c0_i32 = arith.constant 0 : i32
    %c0_i32_0 = arith.constant 0 : i32
    return %arg0, %c0_i32 : i32, i32
  }
  func.func @transform_1(%arg0: i32, %arg1: i32) -> (i32, i32, i32) {
    %c0_i32 = arith.constant 0 : i32
    %c0_i32_0 = arith.constant 0 : i32
    %c0_i32_1 = arith.constant 0 : i32
    return %c0_i32, %c0_i32_0, %arg1 : i32, i32, i32
  }
  func.func @transform_2(%arg0: i32, %arg1: i32) -> (i32, i32, i32) {
    %c0_i32 = arith.constant 0 : i32
    %c0_i32_0 = arith.constant 0 : i32
    %c0_i32_1 = arith.constant 0 : i32
    return %c0_i32, %c0_i32_0, %arg1 : i32, i32, i32
  }
  func.func @transform_3(%arg0: i32, %arg1: i32) -> (i32, i32) {
    %c0_i32 = arith.constant 0 : i32
    return %arg0, %arg1 : i32, i32
  }
}

</mosaic_0001>

<bundles_post_ra>
// kernel: tpu_custom_call.1
= control target key start
LH: loop header
LB: loop body
LE: loop exit
PB: predicated region body
PF: predicated region fallthrough
CT: control target
= control target key end

     0   :  { %8 = vsyncpa [#allocation3], 0  ;;  %s892_s0 = inlined_call_operand.hbm [shape: f32[16,32], index: 0, kind: input, shape index: {}]   ;;  %s893_s1 = inlined_call_operand.hbm [shape: f32[2,32,128], index: 1, kind: input, shape index: {}]   ;;  %s894_s2 = inlined_call_operand.hbm [shape: f32[2,1,128], index: 2, kind: input, shape index: {}]   ;;  %s895_s3 = inlined_call_operand.hbm [shape: f32[16,128], index: 3, kind: output, shape index: {}]  }
   0x1   :  { %10 = vsyncpa [#allocation3 + $0x1], 0 }
   0x2   :  { %11 = vsyncpa [#allocation6], 0 }
   0x3   :  { %12 = vsyncpa [#allocation4], 0 }
   0x4   :  { %14 = vsyncpa [#allocation4 + $0x1], 0  ;;  %s744_s12 = smov 0   ;;  %s746_s13 = smov 0  }
   0x5   :  { %s748_s14 = smov 0   ;;  %s750_s15 = smov 0  }
   0x6   :  { %s752_s16 = smov 0   ;;  %s754_s17 = smov 0  }
   0x7 LB: > { %s432_s18 = sadd.s32 4294967295, %s716_s17   ;;  %p434_p0 = scmp.ge.s32.totalorder %s716_s17, 1  ;;  %s716_s17 = sphi %s754_s17, %s20_s17   ;;  %s712_s16 = sphi %s752_s16, %s905_s16   ;;  %s708_s15 = sphi %s750_s15, %s904_s15   ;;  %s704_s14 = sphi %s748_s14, %s903_s14   ;;  %s700_s13 = sphi %s746_s13, %s902_s13   ;;  %s696_s12 = sphi %s744_s12, %s901_s12  }
   0x8   : > { %p778_p1 = scmp.eq.s32.totalorder %s432_s18, 0  ;;  %p143_p2 = scmp.lt.s32.totalorder %s716_s17, 3 }
   0x9   : > { %s156_s22 = sshll.u32 %s893_s1, 4  ;;  %s718_s24 = smov [#allocation5]   ;;  %s157_s22 = int_to_ptr.hbm [resolvable:$true] %s156_s22 }
   0xa   : > { %p786_p3 = pnand %p434_p0, %p143_p2  ;;  %s158_s25 = sshll.u32 %s718_s24, 4  ;;  %s159_s25 = int_to_ptr.vmem [resolvable:$true] %s158_s25 }
   0xb   : > { %p437_p6 = scmp.ge.s32.totalorder %s716_s17, 2  ;;  %s171_s28 = sshll.u32 %s894_s2, 4  ;;  %s172_s28 = int_to_ptr.hbm [resolvable:$true] %s171_s28 }
   0xc   : > { %p463_p4 = pneg %p786_p3  ;;  %s719_s29 = smov 128  }
   0xd   : > { %s720_s30 = smov 8   ;;  %s721_s4 = smov [#allocation7]  }
   0xe   : > { %p464_p5 = pnand %p463_p4, %p778_p1  ;;  %s173_s5 = sshll.u32 %s721_s4, 4  ;;  %s174_s5 = int_to_ptr.vmem [resolvable:$true] %s173_s5 }
   0xf   : > { %s722_s6 = smov 16   ;;  %s723_s7 = smov 1  }
  0x10   : > { %466 = dma.hbm_to_vmem [thread:$0]  (!%p464_p5), %s157_s22, 1024, %s159_s25, [#allocation6], %s719_s29, %s719_s29, %s720_s30  }
  0x11   : > { %469 = dma.hbm_to_vmem [thread:$0]  (!%p464_p5), %s172_s28, 32, %s174_s5, [#allocation6], %s722_s6, %s722_s6, %s723_s7  }
  0x12   : > { %s32_s8 = sadd.s32 1, %s712_s16  ;;  %s433_s9 = sadd.s32 4294967294, %s716_s17  }
  0x13   : > { %p34_p7 = scmp.ge.s32.totalorder %s32_s8, 2  ;;  %s39_s10 = sadd.s32 1, %s704_s14 }
  0x14   : > { %p46_p8 = scmp.ne.s32.totalorder %s704_s14, %s700_s13  ;;  %p47_p9 = scmp.eq.s32.totalorder %s716_s17, 0 }
  0x15   : > { %s907_s8 = smov (%p34_p7, %s32_s8), 0  ;;  %p52_p10 = scmp.ne.s32.totalorder %s700_s13, %s696_s12 }
  0x16   : > { %s36_s11 = ssub.s32 %s712_s16, %s907_s8  ;;  %p130_p11 = scmp.eq.s32.totalorder %s432_s18, 1 }
  0x17   : > { %p37_p12 = scmp.eq.s32.totalorder %s36_s11, 0  ;;  %p814_p13 = por %p778_p1, %p52_p10 }
  0x18   : > { %p818_p0 = por %p130_p11, %p46_p8  ;;  %p136_p2 = scmp.eq.s32.totalorder %s433_s9, 1 }
  0x19   : > { %s823_s22 = scalar_select %p37_p12, %s704_s14, %s39_s10  }
  0x1a   : > { %p48_p4 = por %p47_p9, %p46_p8  ;;  %p825_p5 = por %p136_p2, %p52_p10 }
  0x1b   : > { %s187_s25 = sand.u32 1, %s704_s14   ;;  %s439_s18 = sshll.u32 %s712_s16, 3 }
  0x1c   : > { %p480_p7 = scmp.lt.s32.totalorder %s716_s17, 2  ;;  %s438_s26 = sshll.u32 %s187_s25, 3 }
  0x1d   : > { %s195_s29 = scalar_lea.hbm %s892_s0, %s439_s18  ;;  %s191_s4 = scalar_lea.vmem [#allocation2], %s438_s26 }
  0x1e   : > { %s197_s30 = sshll.u32 %s195_s29, 4  ;;  %s199_s5 = sshll.u32 %s191_s4, 4  ;;  %s198_s30 = int_to_ptr.hbm [resolvable:$true] %s197_s30  ;;  %s200_s5 = int_to_ptr.vmem [resolvable:$true] %s199_s5 }
  0x1f   : > { %p471_p11 = pnand %p480_p7, %p48_p4  ;;  %s188_s6 = scalar_lea.sflag [#allocation3], %s187_s25 }
  0x20   : > { %208 = sbr.rel (%p786_p3) target bundleno = 183 (0xb7), region = 32  ;;  %s838_s7 = sand.u32 (!%p786_p3), 1, %s700_s13  }
  0x21   : > { %473 = dma.hbm_to_vmem [thread:$0]  (!%p471_p11), %s198_s30, 128, %s200_s5, %s188_s6  }
  0x22   : > { %s441_s9 = sshll.u32 (!%p786_p3), %s838_s7, 3  ;;  %s211_s10 = scalar_lea.sflag (!%p786_p3), [#allocation3], %s838_s7 }
  0x23   : > { %s214_s11 = scalar_lea.vmem (!%p786_p3), [#allocation2], %s441_s9 }
  0x25   : > { %683 = dma.done.wait (%p814_p13), %s211_s10, 128  }
  0x26   : > { %685 = vsyncadd (%p814_p13), %s211_s10, 4294967168 }
  0x27   : > { %687 = dma.done.wait (%p778_p1), [#allocation6], 1056  }
  0x28   : > { %689 = vsyncadd (%p778_p1), [#allocation6], 4294966240  ;;  %v285_v0 = vld [vmem:[#allocation5 + $0x38] sm:$0xff]  ;;  %v284_v2 = vld [vmem:[#allocation5 + $0x30] sm:$0xff]  ;;  %vm257_vm0 = vcmask 261120   ;;  %s448_s19 = sshll.u32 %s708_s15, 3 }
  0x29   : > { %v252_v1 = vld [vmem:[#allocation5 + $0x18] sm:$0xff]  ;;  %303 = vmatpush.msra.mxu1 %v285_v0  ;;  %v251_v3 = vld [vmem:[#allocation5 + $0x10] sm:$0xff]  ;;  %v283_v4 = vld [vmem:[#allocation5 + $0x28] sm:$0xff]  ;;  %s326_s25 = scalar_lea.hbm %s895_s3, %s448_s19  ;;  %s247_s18 = scalar_lea.vmem [#allocation8], %s441_s9 }
  0x2a   : > { %273 = vmatpush.msra.mxu0 %v252_v1  ;;  %v250_v5 = vld [vmem:[#allocation5 + $0x8] sm:$0xff]  ;;  %v282_v6 = vld [vmem:[#allocation5 + $0x20] sm:$0xff]  ;;  %v248_v8 = vld [vmem:[%s214_s11] sm:$0xff]  ;;  %s328_s26 = sshll.u32 %s247_s18, 4  ;;  %s330_s27 = sshll.u32 %s326_s25, 4  ;;  %s329_s26 = int_to_ptr.vmem [resolvable:$true] %s328_s26  ;;  %s331_s27 = int_to_ptr.hbm [resolvable:$true] %s330_s27 }
  0x2b   : > { %304 = vmatpush.msra.mxu1 %v284_v2  ;;  %v249_v7 = vld [vmem:[#allocation5] sm:$0xff]  ;;  %s315_s15 = scalar_lea.sflag [#allocation4], %s838_s7  ;;  %s644_s28 = sshra.s32 %s331_s27, 4  ;;  %s645_s28 = int_to_ptr.hbm [resolvable:$true] %s644_s28 }
  0x2c   : > { %274 = vmatpush.msra.mxu0 %v251_v3  ;;  %v538_v9 = vld [vmem:[#allocation7 + $0x1] ss:$0 sm:$0xff]  ;;  %v539_v10 = vld [vmem:[#allocation7] ss:$0 sm:$0xff]  ;;  %s646_s29 = scalar_lea.hbm %s645_s28, 8  ;;  %s650_s5 = scalar_lea.hbm %s895_s3, 16 }
  0x2d   : > { %305 = vmatpush.msra.mxu1 %v283_v4  ;;  %p647_p1 = scmp.ne.s32.totalorder %s645_s28, %s646_s29  ;;  %p651_p9 = scmp.lt.s32.totalorder %s645_s28, %s895_s3 }
  0x2e   : > { %275 = vmatpush.msra.mxu0 %v250_v5  ;;  %p652_p10 = scmp.lt.s32.totalorder %s650_s5, %s646_s29 }
  0x2f   : > { %306 = vmatpush.msra.mxu1 %v282_v6  ;;  %p648_p3 = pnand %p647_p1, %p818_p0 }
  0x30   : > { %276 = vmatpush.msra.mxu0 %v249_v7  ;;  %446 = vmatmul.msk.f32.vlgmr.msra.gmra.mxu1 %vm257_vm0, %v248_v8  ;;  %p653_p12 = por %p652_p10, %p651_p9 }
  0x31   : > { %445 = vmatmul.msk.f32.vlgmr.msra.gmra.mxu0 %vm257_vm0, %v248_v8  ;;  %p649_p8 = pneg %p648_p3 }
  0x33   : > { %p654_p13 = pnand %p653_p12, %p649_p8 }
  0xad   : > { %v308_v11 = vpop.f32.mrf.mxu1 }
  0xae   : > { %v278_v12 = vpop.f32.mrf.mxu0  ;;  %v309_v13 = vadd.f32 %v538_v9, %v308_v11 }
  0xaf   : > { %v279_v14 = vadd.f32 %v539_v10, %v278_v12 }
  0xb0   : > { %v311_v15 = vmul.f32 %v309_v13, %v309_v13 }
  0xb2   : > { %v312_v16 = vadd.f32 %v311_v15, %v279_v14 }
  0xb4   : > { %313 = vst [vmem:[%s247_s18] sm:$0xff] %v312_v16 }
  0xb5   : > { %657 = shalt.err (!%p654_p13)
}
  0xb6   : > { %461 = dma.vmem_to_hbm [thread:$0]  (%p818_p0), %s329_s26, 128, %s331_s27, %s315_s15  }
  0xb7 PF: > { %s342_s7 = sand.u32 1, %s696_s12   ;;  %p475_p2 = pnand %p437_p6, %p825_p5 }
  0xb8   : > { %s343_s10 = scalar_lea.sflag [#allocation4], %s342_s7 }
  0xb9   : > { %p476_p4 = pneg %p475_p2 }
  0xbb   : > { %691 = dma.done.wait (%p476_p4), %s343_s10, 128  }
  0xbc   : > { %693 = vsyncadd (%p476_p4), %s343_s10, 4294967168  ;;  %s20_s17 = sadd.s32 1, %s716_s17   ;;  %s901_s12 = smov %s700_s13 }
  0xbd   : > { %p17_p7 = scmp.ge.s32.totalorder %s20_s17, 4   ;;  %s902_s13 = smov %s704_s14 }
  0xbe   : > { %s903_s14 = smov %s823_s22  ;;  %s904_s15 = smov %s712_s16 }
  0xbf   : > { %s905_s16 = smov %s907_s8  ;;  %19 = sbr.rel (!%p17_p7) target bundleno = 7 (0x7), region = 89 }
  0xc4   :  { %349 = vsyncpa [#allocation3], 1 }
  0xc5   :  { %351 = vsyncpa [#allocation3 + $0x1], 1 }
  0xc6   :  { %352 = vsyncpa [#allocation6], 1 }
  0xc7   :  { %353 = vsyncpa [#allocation4], 1 }
  0xc8   :  { %355 = vsyncpa [#allocation4 + $0x1], 1 }

</bundles_post_ra>
